<compile_context>
chip_gen: v5e
topology: v5e:2x2
jax: 0.10.0
libtpu: 0.0.40
codegen_flags: <defaults>
</compile_context>

<pallas_src>
import functools

import jax
import jax.numpy as jnp
from jax.experimental import pallas as pl
from jax.experimental.pallas import tpu as pltpu

LANE = 128


def _round_up(n, m):
    return ((n + m - 1) // m) * m


def deepnet_kernel(x_ref, w1_ref, b1_ref, w2_ref, b2_ref, w3_ref, b3_ref, o_ref,
                   *, num_repeat):
    bt = x_ref.shape[0]
    hid_p = w1_ref.shape[1]

    # fc1 + relu: bf16 operands, f32 accumulation on the MXU, f32 elementwise.
    h = jnp.dot(x_ref[...], w1_ref[...], preferred_element_type=jnp.float32)
    h = jnp.maximum(h + b1_ref[...], 0.0)

    # Hoist invariant loads once: vld + broadcast_in_dim are not CSE'd per iteration.
    w2 = w2_ref[...]                                     # bf16 (hid_p, hid_p)
    b2 = jnp.broadcast_to(b2_ref[...], (bt, hid_p))      # f32  (bt, hid_p)

    def mid_layer(hh):
        hh = jnp.dot(hh.astype(jnp.bfloat16), w2, preferred_element_type=jnp.float32)
        return jnp.maximum(hh + b2, 0.0)

    if num_repeat <= 4:
        # Short chain: static unroll keeps full LLO scheduler visibility.
        for _ in range(num_repeat):
            h = mid_layer(h)
    else:
        # Deep chain: bound vreg live ranges (avoid spills), small unroll for overlap.
        h = jax.lax.fori_loop(0, num_repeat, lambda _, hh: mid_layer(hh), h,
                              unroll=2)

    out = jnp.dot(h.astype(jnp.bfloat16), w3_ref[...],
                  preferred_element_type=jnp.float32) + b3_ref[...]
    o_ref[...] = out.astype(o_ref.dtype)


def deepnet_forward(x, params, num_layers, *, batch_tile=128):
    """x: (B, input_size) f32; params: f32 (w1, b1, w2, b2, w3, b3), W stored (in, out)."""
    w1, b1, w2, b2, w3, b3 = params
    B, in_sz = x.shape
    hid = w1.shape[1]
    num_repeat = num_layers - 2

    # Pad feature/hidden dims to lane width (128) and batch to the batch tile.
    in_p = _round_up(in_sz, LANE)
    hid_p = _round_up(hid, LANE)
    bt = batch_tile
    B_p = _round_up(B, bt)

    def pad2(a, rows, cols, dtype):
        a = a.astype(dtype)
        return jnp.pad(a, ((0, rows - a.shape[0]), (0, cols - a.shape[1])))

    # Matmul operands in bf16 (halves weight DMA/VMEM); biases stay f32.
    x_p = pad2(x, B_p, in_p, jnp.bfloat16)
    w1_p = pad2(w1, in_p, hid_p, jnp.bfloat16)
    w2_p = pad2(w2, hid_p, hid_p, jnp.bfloat16)
    w3_p = pad2(w3, hid_p, in_p, jnp.bfloat16)
    b1_p = pad2(b1, 1, hid_p, jnp.float32)
    b2_p = pad2(b2, 1, hid_p, jnp.float32)
    b3_p = pad2(b3, 1, in_p, jnp.float32)

    kernel = functools.partial(deepnet_kernel, num_repeat=num_repeat)
    full = lambda shape: pl.BlockSpec(shape, lambda i: (0, 0))

    # Rough VMEM budget: double-buffered tiles + f32 intermediates, with headroom.
    est = (2 * bt * in_p * (2 + 4)                                    # x (bf16) + out (f32)
           + 2 * 2 * (in_p * hid_p + hid_p * hid_p + hid_p * in_p)    # bf16 weights (x2 buf)
           + 2 * 4 * (2 * hid_p + in_p)                               # f32 biases
           + 4 * 4 * bt * hid_p)                                      # live f32 intermediates
    vmem_limit = int(min(48 * 1024 * 1024, max(16 * 1024 * 1024, 2 * est)))

    flops = 2 * B_p * (in_p * hid_p + num_repeat * hid_p * hid_p + hid_p * in_p)
    bytes_accessed = (x_p.size * 2 + B_p * in_p * 4
                      + (w1_p.size + w2_p.size + w3_p.size) * 2
                      + (b1_p.size + b2_p.size + b3_p.size) * 4)

    out_p = pl.pallas_call(
        kernel,
        out_shape=jax.ShapeDtypeStruct((B_p, in_p), jnp.float32),
        grid_spec=pltpu.PrefetchScalarGridSpec(
            num_scalar_prefetch=0,
            grid=(B_p // bt,),
            in_specs=[
                pl.BlockSpec((bt, in_p), lambda i: (i, 0)),   # x tile
                full((in_p, hid_p)),    # w1 (grid-invariant, stays resident)
                full((1, hid_p)),       # b1
                full((hid_p, hid_p)),   # w2
                full((1, hid_p)),       # b2
                full((hid_p, in_p)),    # w3
                full((1, in_p)),        # b3
            ],
            out_specs=pl.BlockSpec((bt, in_p), lambda i: (i, 0)),
        ),
        compiler_params=pltpu.CompilerParams(
            dimension_semantics=("parallel",),
            vmem_limit_bytes=vmem_limit,
        ),
        cost_estimate=pl.CostEstimate(
            flops=flops, transcendentals=0, bytes_accessed=bytes_accessed),
    )(x_p, w1_p, b1_p, w2_p, b2_p, w3_p, b3_p)

    # TODO(synk): for large hidden sizes (>= ~2-4K) the full (hid,hid) w2 no longer fits
    # VMEM; tile w2 over N (and K with a pl.when-initialized accumulator, reduction axis
    # last + "arbitrary") instead of loading it whole.
    return out_p[:B, :in_sz]


def make_params(key, input_size, hidden_size):
    # Deterministic synthetic init (roughly matches nn.Linear's uniform scaling).
    ks = jax.random.split(key, 6)

    def lin(kw, kb, fan_in, fan_out):
        bound = 1.0 / jnp.sqrt(fan_in)
        w = jax.random.uniform(kw, (fan_in, fan_out), jnp.float32, -bound, bound)
        b = jax.random.uniform(kb, (1, fan_out), jnp.float32, -bound, bound)
        return w, b

    w1, b1 = lin(ks[0], ks[1], input_size, hidden_size)
    w2, b2 = lin(ks[2], ks[3], hidden_size, hidden_size)
    w3, b3 = lin(ks[4], ks[5], hidden_size, input_size)
    return (w1, b1, w2, b2, w3, b3)


def reference_forward(x, params, num_layers):
    w1, b1, w2, b2, w3, b3 = params
    h = jnp.maximum(x @ w1 + b1, 0.0)
    for _ in range(num_layers - 2):
        h = jnp.maximum(h @ w2 + b2, 0.0)
    return h @ w3 + b3


if __name__ == "__main__":
    input_size, hidden_size, num_layers = 16, 32, 4
    batch = 8

    key = jax.random.PRNGKey(0)
    kx, kp = jax.random.split(key)
    x = jax.random.normal(kx, (batch, input_size), jnp.float32)
    params = make_params(kp, input_size, hidden_size)

    out = deepnet_forward(x, params, num_layers)
    out = jax.block_until_ready(out)

    ref = reference_forward(x, params, num_layers)
    assert out.shape == (batch, input_size)
    # Matmuls run with bf16 operands (f32 accumulation) -> compare to f32 reference loosely.
    assert jnp.allclose(out, ref, atol=5e-2, rtol=5e-2), float(jnp.max(jnp.abs(out - ref)))

    print("KERNEL_OK")
</pallas_src>

<mosaic_0001>
module attributes {stable_mosaic.version = 11 : i64} {
  func.func @deepnet_kernel(%arg0: i32, %arg1: memref<128x128xbf16, #tpu.memory_space<vmem>>, %arg2: memref<128x128xbf16, #tpu.memory_space<vmem>>, %arg3: memref<1x128xf32, #tpu.memory_space<vmem>>, %arg4: memref<128x128xbf16, #tpu.memory_space<vmem>>, %arg5: memref<1x128xf32, #tpu.memory_space<vmem>>, %arg6: memref<128x128xbf16, #tpu.memory_space<vmem>>, %arg7: memref<1x128xf32, #tpu.memory_space<vmem>>, %arg8: memref<128x128xf32, #tpu.memory_space<vmem>>) attributes {dimension_semantics = [#tpu.dimension_semantics<parallel>], iteration_bounds = array<i64: 1>, scalar_prefetch = 0 : i64, scratch_operands = 0 : i64, tpu.core_type = #tpu.core_type<tc>, window_params = [{transform_indices = @transform_0, window_bounds = array<i64: 128, 128>}, {pipeline_mode = #tpu.pipeline_mode<synchronous>, transform_indices = @transform_1, window_bounds = array<i64: 128, 128>}, {pipeline_mode = #tpu.pipeline_mode<synchronous>, transform_indices = @transform_2, window_bounds = array<i64: 1, 128>}, {pipeline_mode = #tpu.pipeline_mode<synchronous>, transform_indices = @transform_3, window_bounds = array<i64: 128, 128>}, {pipeline_mode = #tpu.pipeline_mode<synchronous>, transform_indices = @transform_4, window_bounds = array<i64: 1, 128>}, {pipeline_mode = #tpu.pipeline_mode<synchronous>, transform_indices = @transform_5, window_bounds = array<i64: 128, 128>}, {pipeline_mode = #tpu.pipeline_mode<synchronous>, transform_indices = @transform_6, window_bounds = array<i64: 1, 128>}, {transform_indices = @transform_7, window_bounds = array<i64: 128, 128>}]} {
    %c0 = arith.constant 0 : index
    %c0_0 = arith.constant 0 : index
    %0 = vector.load %arg1[%c0, %c0_0] : memref<128x128xbf16, #tpu.memory_space<vmem>>, vector<128x128xbf16>
    %c0_1 = arith.constant 0 : index
    %c0_2 = arith.constant 0 : index
    %1 = vector.load %arg2[%c0_1, %c0_2] : memref<128x128xbf16, #tpu.memory_space<vmem>>, vector<128x128xbf16>
    %cst = arith.constant dense<0.000000e+00> : vector<128x128xf32>
    %2 = tpu.matmul %0, %1, %cst {dimension_numbers = #tpu.dot_dimension_numbers<[1], [0], [0], [1], [0, 0, 1, 1], [], []>} : vector<128x128xbf16>, vector<128x128xbf16>, vector<128x128xf32> -> vector<128x128xf32>
    %c0_3 = arith.constant 0 : index
    %c0_4 = arith.constant 0 : index
    %3 = vector.load %arg3[%c0_3, %c0_4] : memref<1x128xf32, #tpu.memory_space<vmem>>, vector<1x128xf32>
    %4 = vector.broadcast %3 : vector<1x128xf32> to vector<128x128xf32>
    %5 = arith.addf %2, %4 : vector<128x128xf32>
    %cst_5 = arith.constant 0.000000e+00 : f32
    %6 = vector.broadcast %cst_5 : f32 to vector<128x128xf32>
    %7 = arith.maximumf %5, %6 : vector<128x128xf32>
    %c0_6 = arith.constant 0 : index
    %c0_7 = arith.constant 0 : index
    %8 = vector.load %arg4[%c0_6, %c0_7] : memref<128x128xbf16, #tpu.memory_space<vmem>>, vector<128x128xbf16>
    %c0_8 = arith.constant 0 : index
    %c0_9 = arith.constant 0 : index
    %9 = vector.load %arg5[%c0_8, %c0_9] : memref<1x128xf32, #tpu.memory_space<vmem>>, vector<1x128xf32>
    %10 = vector.shape_cast %9 : vector<1x128xf32> to vector<1x128xf32>
    %11 = vector.broadcast %10 : vector<1x128xf32> to vector<128x128xf32>
    %12 = arith.truncf %7 : vector<128x128xf32> to vector<128x128xbf16>
    %cst_10 = arith.constant dense<0.000000e+00> : vector<128x128xf32>
    %13 = tpu.matmul %12, %8, %cst_10 {dimension_numbers = #tpu.dot_dimension_numbers<[1], [0], [0], [1], [0, 0, 1, 1], [], []>} : vector<128x128xbf16>, vector<128x128xbf16>, vector<128x128xf32> -> vector<128x128xf32>
    %14 = arith.addf %13, %11 : vector<128x128xf32>
    %cst_11 = arith.constant 0.000000e+00 : f32
    %15 = vector.broadcast %cst_11 : f32 to vector<128x128xf32>
    %16 = arith.maximumf %14, %15 : vector<128x128xf32>
    %17 = arith.truncf %16 : vector<128x128xf32> to vector<128x128xbf16>
    %cst_12 = arith.constant dense<0.000000e+00> : vector<128x128xf32>
    %18 = tpu.matmul %17, %8, %cst_12 {dimension_numbers = #tpu.dot_dimension_numbers<[1], [0], [0], [1], [0, 0, 1, 1], [], []>} : vector<128x128xbf16>, vector<128x128xbf16>, vector<128x128xf32> -> vector<128x128xf32>
    %19 = arith.addf %18, %11 : vector<128x128xf32>
    %cst_13 = arith.constant 0.000000e+00 : f32
    %20 = vector.broadcast %cst_13 : f32 to vector<128x128xf32>
    %21 = arith.maximumf %19, %20 : vector<128x128xf32>
    %22 = arith.truncf %21 : vector<128x128xf32> to vector<128x128xbf16>
    %c0_14 = arith.constant 0 : index
    %c0_15 = arith.constant 0 : index
    %23 = vector.load %arg6[%c0_14, %c0_15] : memref<128x128xbf16, #tpu.memory_space<vmem>>, vector<128x128xbf16>
    %cst_16 = arith.constant dense<0.000000e+00> : vector<128x128xf32>
    %24 = tpu.matmul %22, %23, %cst_16 {dimension_numbers = #tpu.dot_dimension_numbers<[1], [0], [0], [1], [0, 0, 1, 1], [], []>} : vector<128x128xbf16>, vector<128x128xbf16>, vector<128x128xf32> -> vector<128x128xf32>
    %c0_17 = arith.constant 0 : index
    %c0_18 = arith.constant 0 : index
    %25 = vector.load %arg7[%c0_17, %c0_18] : memref<1x128xf32, #tpu.memory_space<vmem>>, vector<1x128xf32>
    %26 = vector.broadcast %25 : vector<1x128xf32> to vector<128x128xf32>
    %27 = arith.addf %24, %26 : vector<128x128xf32>
    %c0_19 = arith.constant 0 : index
    %c0_20 = arith.constant 0 : index
    %28 = vector.load %arg8[%c0_19, %c0_20] : memref<128x128xf32, #tpu.memory_space<vmem>>, vector<128x128xf32>
    tpu.vector_store %arg8[%c0_19, %c0_20], %27 {strides = array<i32>} : memref<128x128xf32, #tpu.memory_space<vmem>>, vector<128x128xf32>,
    return
  }
  func.func @transform_0(%arg0: i32) -> (i32, i32) {
    %c0_i32 = arith.constant 0 : i32
    %c0_i32_0 = arith.constant 0 : i32
    return %arg0, %c0_i32 : i32, i32
  }
  func.func @transform_1(%arg0: i32) -> (i32, i32) {
    %c0_i32 = arith.constant 0 : i32
    %c0_i32_0 = arith.constant 0 : i32
    %c0_i32_1 = arith.constant 0 : i32
    return %c0_i32, %c0_i32_0 : i32, i32
  }
  func.func @transform_2(%arg0: i32) -> (i32, i32) {
    %c0_i32 = arith.constant 0 : i32
    %c0_i32_0 = arith.constant 0 : i32
    %c0_i32_1 = arith.constant 0 : i32
    return %c0_i32, %c0_i32_0 : i32, i32
  }
  func.func @transform_3(%arg0: i32) -> (i32, i32) {
    %c0_i32 = arith.constant 0 : i32
    %c0_i32_0 = arith.constant 0 : i32
    %c0_i32_1 = arith.constant 0 : i32
    return %c0_i32, %c0_i32_0 : i32, i32
  }
  func.func @transform_4(%arg0: i32) -> (i32, i32) {
    %c0_i32 = arith.constant 0 : i32
    %c0_i32_0 = arith.constant 0 : i32
    %c0_i32_1 = arith.constant 0 : i32
    return %c0_i32, %c0_i32_0 : i32, i32
  }
  func.func @transform_5(%arg0: i32) -> (i32, i32) {
    %c0_i32 = arith.constant 0 : i32
    %c0_i32_0 = arith.constant 0 : i32
    %c0_i32_1 = arith.constant 0 : i32
    return %c0_i32, %c0_i32_0 : i32, i32
  }
  func.func @transform_6(%arg0: i32) -> (i32, i32) {
    %c0_i32 = arith.constant 0 : i32
    %c0_i32_0 = arith.constant 0 : i32
    %c0_i32_1 = arith.constant 0 : i32
    return %c0_i32, %c0_i32_0 : i32, i32
  }
  func.func @transform_7(%arg0: i32) -> (i32, i32) {
    %c0_i32 = arith.constant 0 : i32
    %c0_i32_0 = arith.constant 0 : i32
    return %arg0, %c0_i32 : i32, i32
  }
}

</mosaic_0001>

<bundles_post_ra>
// kernel: tpu_custom_call.1
= control target key start
LH: loop header
LB: loop body
LE: loop exit
PB: predicated region body
PF: predicated region fallthrough
CT: control target
= control target key end

     0   :  { %12 = vsyncpa [#allocation3], 0  ;;  %s1070_s0 = inlined_call_operand.hbm [shape: bf16[128,128], index: 0, kind: input, shape index: {}]   ;;  %s1071_s1 = inlined_call_operand.hbm [shape: bf16[128,128], index: 1, kind: input, shape index: {}]   ;;  %s1072_s2 = inlined_call_operand.vmem [shape: f32[1,128], index: 2, kind: input, shape index: {}]   ;;  %s1073_s3 = inlined_call_operand.hbm [shape: bf16[128,128], index: 3, kind: input, shape index: {}]   ;;  %s1074_s4 = inlined_call_operand.vmem [shape: f32[1,128], index: 4, kind: input, shape index: {}]   ;;  %s1075_s5 = inlined_call_operand.hbm [shape: bf16[128,128], index: 5, kind: input, shape index: {}]   ;;  %s1076_s6 = inlined_call_operand.vmem [shape: f32[1,128], index: 6, kind: input, shape index: {}]   ;;  %s1077_s7 = inlined_call_operand.hbm [shape: f32[128,128], index: 7, kind: output, shape index: {}]  }
   0x1   :  { %13 = vsyncpa [#allocation6], 0 }
   0x2   :  { %14 = vsyncpa [#allocation9], 0 }
   0x3   :  { %15 = vsyncpa [#allocation4], 0  ;;  %s33_s26 = sshll.u32 %s1071_s1, 4  ;;  %s963_s27 = smov [#allocation5]   ;;  %s34_s26 = int_to_ptr.hbm [resolvable:$true] %s33_s26 }
   0x4   :  { %s35_s28 = sshll.u32 %s963_s27, 4  ;;  %s20_s8 = sshll.u32 %s1070_s0, 4  ;;  %s36_s28 = int_to_ptr.vmem [resolvable:$true] %s35_s28  ;;  %s21_s8 = int_to_ptr.hbm [resolvable:$true] %s20_s8 }
   0x5   :  { %s964_s9 = smov 64   ;;  %s965_s10 = smov 4  }
   0x6   :  { %41 = dma.hbm_to_vmem [thread:$0]  %s34_s26, 1024, %s36_s28, [#allocation6], %s964_s9, %s964_s9, %s965_s10  }
   0x7   :  { %s966_s11 = smov [#allocation2]   ;;  %s48_s15 = sshll.u32 %s1073_s3, 4  ;;  %s49_s15 = int_to_ptr.hbm [resolvable:$true] %s48_s15 }
   0x8   :  { %s22_s12 = sshll.u32 %s966_s11, 4  ;;  %s63_s17 = sshll.u32 %s1075_s5, 4  ;;  %s23_s12 = int_to_ptr.vmem [resolvable:$true] %s22_s12  ;;  %s64_s17 = int_to_ptr.hbm [resolvable:$true] %s63_s17 }
   0x9   :  { %28 = dma.hbm_to_vmem [thread:$0]  %s21_s8, 1024, %s23_s12, [#allocation3], %s964_s9, %s964_s9, %s965_s10  }
   0xa   :  { %s967_s18 = smov [#allocation7]   ;;  %s968_s0 = smov [#allocation8]  }
   0xb   :  { %s50_s19 = sshll.u32 %s967_s18, 4  ;;  %s65_s20 = sshll.u32 %s968_s0, 4  ;;  %s51_s19 = int_to_ptr.vmem [resolvable:$true] %s50_s19  ;;  %s66_s20 = int_to_ptr.vmem [resolvable:$true] %s65_s20 }
   0xc   :  { %56 = dma.hbm_to_vmem [thread:$0]  %s49_s15, 1024, %s51_s19, [#allocation6], %s964_s9, %s964_s9, %s965_s10  }
   0xd   :  { %71 = dma.hbm_to_vmem [thread:$0]  %s64_s17, 1024, %s66_s20, [#allocation9], %s964_s9, %s964_s9, %s965_s10  }
   0xe   :  { %955 = dma.done.wait [#allocation3], 1024  }
   0xf   :  { %956 = vsyncadd [#allocation3], 4294966272 }
  0x10   :  { %957 = dma.done.wait [#allocation6], 2048  }
  0x11   :  { %958 = vsyncadd [#allocation6], 4294965248 }
  0x12   :  { %959 = dma.done.wait [#allocation9], 1024  }
  0x13   :  { %960 = vsyncadd [#allocation9], 4294966272  ;;  %v806_v0 = vld [vmem:[#allocation5 + $0x38] sm:$0xff]  ;;  %v805_v1 = vld [vmem:[#allocation5 + $0x30] sm:$0xff]  ;;  %s648_s26 = sshll.u32 %s1077_s7, 4  ;;  %s970_s27 = smov 128   ;;  %s649_s26 = int_to_ptr.hbm [resolvable:$true] %s648_s26 }
  0x14   :  { %222 = vmatpush.bf16.msra.mxu0 %v806_v0  ;;  %v804_v2 = vld [vmem:[#allocation5 + $0x28] sm:$0xff]  ;;  %v803_v3 = vld [vmem:[#allocation5 + $0x20] sm:$0xff]  ;;  %v802_v4 = vld [vmem:[#allocation5 + $0x18] sm:$0xff]  ;;  %s971_s28 = smov 8  }
  0x15   :  { %v801_v5 = vld [vmem:[#allocation5 + $0x10] sm:$0xff]  ;;  %v800_v6 = vld [vmem:[#allocation5 + $0x8] sm:$0xff]  ;;  %v799_v7 = vld [vmem:[#allocation5] sm:$0xff] }
  0x16   :  { %v791_v8 = vld [vmem:[#allocation2] sm:$0xff]  ;;  %v792_v9 = vld [vmem:[#allocation2 + $0x8] sm:$0xff]  ;;  %v793_v10 = vld [vmem:[#allocation2 + $0x10] sm:$0xff] }
  0x17   :  { %v794_v11 = vld [vmem:[#allocation2 + $0x18] sm:$0xff]  ;;  %v795_v12 = vld [vmem:[#allocation2 + $0x20] sm:$0xff]  ;;  %v796_v14 = vld [vmem:[#allocation2 + $0x28] sm:$0xff] }
  0x18   :  { %223 = vmatpush.bf16.msra.mxu0 %v805_v1  ;;  %v814_v13 = vld [vmem:[#allocation7 + $0x38] sm:$0xff]  ;;  %v813_v15 = vld [vmem:[#allocation7 + $0x30] sm:$0xff]  ;;  %v812_v16 = vld [vmem:[#allocation7 + $0x28] sm:$0xff] }
  0x19   :  { %363 = vmatpush.bf16.msra.mxu1 %v814_v13  ;;  %436 = vmatpush.bf16.msra.mxu2 %v814_v13  ;;  %v811_v17 = vld [vmem:[#allocation7 + $0x20] sm:$0xff]  ;;  %v810_v18 = vld [vmem:[#allocation7 + $0x18] sm:$0xff]  ;;  %v797_v19 = vld [vmem:[#allocation2 + $0x30] sm:$0xff] }
  0x1a   :  { %v809_v20 = vld [vmem:[#allocation7 + $0x10] sm:$0xff]  ;;  %v808_v21 = vld [vmem:[#allocation7 + $0x8] sm:$0xff]  ;;  %v807_v22 = vld [vmem:[#allocation7] sm:$0xff] }
  0x1b   :  { %v798_v23 = vld [vmem:[#allocation2 + $0x38] sm:$0xff]  ;;  %v832_v25 = vld [vmem:[%s1072_s2] ss:$0 sm:$0xff] }
  0x1c   :  { %224 = vmatpush.bf16.msra.mxu0 %v804_v2 }
  0x1d   :  { %364 = vmatpush.bf16.msra.mxu1 %v813_v15  ;;  %437 = vmatpush.bf16.msra.mxu2 %v813_v15 }
  0x20   :  { %225 = vmatpush.bf16.msra.mxu0 %v803_v3 }
  0x21   :  { %365 = vmatpush.bf16.msra.mxu1 %v812_v16  ;;  %438 = vmatpush.bf16.msra.mxu2 %v812_v16 }
  0x24   :  { %226 = vmatpush.bf16.msra.mxu0 %v802_v4 }
  0x25   :  { %366 = vmatpush.bf16.msra.mxu1 %v811_v17  ;;  %439 = vmatpush.bf16.msra.mxu2 %v811_v17 }
  0x28   :  { %227 = vmatpush.bf16.msra.mxu0 %v801_v5 }
  0x29   :  { %367 = vmatpush.bf16.msra.mxu1 %v810_v18  ;;  %440 = vmatpush.bf16.msra.mxu2 %v810_v18  ;;  %v1030_v18 = vld [vmem:[%s1074_s4] ss:$0 sm:$0xff] }
  0x2c   :  { %228 = vmatpush.bf16.msra.mxu0 %v800_v6 }
  0x2d   :  { %368 = vmatpush.bf16.msra.mxu1 %v809_v20  ;;  %441 = vmatpush.bf16.msra.mxu2 %v809_v20 }
  0x30   :  { %229 = vmatpush.bf16.msra.mxu0 %v799_v7 }
  0x31   :  { %369 = vmatpush.bf16.msra.mxu1 %v808_v21  ;;  %442 = vmatpush.bf16.msra.mxu2 %v808_v21 }
  0x33   :  { %230 = vmatmul.bf16.vlgmr.msra.gmra.mxu0 %v791_v8 }
  0x35   :  { %370 = vmatpush.bf16.msra.mxu1 %v807_v22  ;;  %443 = vmatpush.bf16.msra.mxu2 %v807_v22 }
  0x43   :  { %235 = vmatmul.bf16.gmra.mxu0 %v792_v9 }
  0x53   :  { %240 = vmatmul.bf16.gmra.mxu0 %v793_v10 }
  0x63   :  { %245 = vmatmul.bf16.gmra.mxu0 %v794_v11 }
  0x73   :  { %250 = vmatmul.bf16.gmra.mxu0 %v795_v12 }
  0x83   :  { %255 = vmatmul.bf16.gmra.mxu0 %v796_v14 }
  0x93   :  { %260 = vmatmul.bf16.gmra.mxu0 %v797_v19 }
  0xa3   :  { %265 = vmatmul.bf16.gmra.mxu0 %v798_v23 }
  0xb0   :  { %v231_v24 = vpop.f32.mrf.mxu0 }
  0xb1   :  { %v232_v26 = vadd.f32 %v832_v25, %v231_v24 }
  0xb3   :  { %v271_v29 = vmax.f32 %v232_v26, 0.0 }
  0xb8   :  { %v233_v27 = vpop.f32.mrf.mxu0 }
  0xb9   :  { %v234_v28 = vadd.f32 %v832_v25, %v233_v27 }
  0xbb   :  { %v272_v30 = vmax.f32 %v234_v28, 0.0 }
  0xbd   :  { %v307_v31 = vpack.c.bf16 %v272_v30, %v271_v29 }
  0xbf   :  { %371 = vmatmul.bf16.vlgmr.msra.gmra.mxu1 %v307_v31 }
  0xc0   :  { %v236_v32 = vpop.f32.mrf.mxu0 }
  0xc1   :  { %v237_v33 = vadd.f32 %v832_v25, %v236_v32 }
  0xc3   :  { %v273_v36 = vmax.f32 %v237_v33, 0.0 }
  0xc8   :  { %v238_v34 = vpop.f32.mrf.mxu0 }
  0xc9   :  { %v239_v35 = vadd.f32 %v832_v25, %v238_v34 }
  0xcb   :  { %v274_v37 = vmax.f32 %v239_v35, 0.0 }
  0xcd   :  { %v308_v38 = vpack.c.bf16 %v274_v37, %v273_v36 }
  0xcf   :  { %376 = vmatmul.bf16.gmra.mxu1 %v308_v38 }
  0xd0   :  { %v241_v39 = vpop.f32.mrf.mxu0 }
  0xd1   :  { %v242_v40 = vadd.f32 %v832_v25, %v241_v39 }
  0xd3   :  { %v275_v43 = vmax.f32 %v242_v40, 0.0 }
  0xd8   :  { %v243_v41 = vpop.f32.mrf.mxu0 }
  0xd9   :  { %v244_v42 = vadd.f32 %v832_v25, %v243_v41 }
  0xdb   :  { %v276_v44 = vmax.f32 %v244_v42, 0.0 }
  0xdd   :  { %v309_v45 = vpack.c.bf16 %v276_v44, %v275_v43 }
  0xdf   :  { %381 = vmatmul.bf16.gmra.mxu1 %v309_v45 }
  0xe0   :  { %v246_v46 = vpop.f32.mrf.mxu0 }
  0xe1   :  { %v247_v47 = vadd.f32 %v832_v25, %v246_v46 }
  0xe3   :  { %v277_v50 = vmax.f32 %v247_v47, 0.0 }
  0xe8   :  { %v248_v48 = vpop.f32.mrf.mxu0 }
  0xe9   :  { %v249_v49 = vadd.f32 %v832_v25, %v248_v48 }
  0xeb   :  { %v278_v51 = vmax.f32 %v249_v49, 0.0 }
  0xed   :  { %v310_v52 = vpack.c.bf16 %v278_v51, %v277_v50 }
  0xef   :  { %386 = vmatmul.bf16.gmra.mxu1 %v310_v52 }
  0xf0   :  { %v251_v53 = vpop.f32.mrf.mxu0 }
  0xf1   :  { %v252_v54 = vadd.f32 %v832_v25, %v251_v53 }
  0xf3   :  { %v279_v57 = vmax.f32 %v252_v54, 0.0 }
  0xf8   :  { %v253_v55 = vpop.f32.mrf.mxu0 }
  0xf9   :  { %v254_v56 = vadd.f32 %v832_v25, %v253_v55 }
  0xfb   :  { %v280_v58 = vmax.f32 %v254_v56, 0.0 }
  0xfd   :  { %v311_v59 = vpack.c.bf16 %v280_v58, %v279_v57 }
  0xff   :  { %391 = vmatmul.bf16.gmra.mxu1 %v311_v59 }
 0x100   :  { %v256_v60 = vpop.f32.mrf.mxu0 }
 0x101   :  { %v257_v61 = vadd.f32 %v832_v25, %v256_v60  ;;  %v822_v60 = vld [vmem:[#allocation8 + $0x38] sm:$0xff] }
 0x102   :  { %577 = vmatpush.bf16.msra.mxu3 %v822_v60 }
 0x103   :  { %v281_v0 = vmax.f32 %v257_v61, 0.0 }
 0x108   :  { %v258_v62 = vpop.f32.mrf.mxu0 }
 0x109   :  { %v259_v63 = vadd.f32 %v832_v25, %v258_v62  ;;  %v821_v62 = vld [vmem:[#allocation8 + $0x30] sm:$0xff] }
 0x10a   :  { %578 = vmatpush.bf16.msra.mxu3 %v821_v62 }
 0x10b   :  { %v282_v1 = vmax.f32 %v259_v63, 0.0  ;;  %v820_v63 = vld [vmem:[#allocation8 + $0x28] sm:$0xff] }
 0x10d   :  { %v312_v2 = vpack.c.bf16 %v282_v1, %v281_v0 }
 0x10e   :  { %579 = vmatpush.bf16.msra.mxu3 %v820_v63 }
 0x10f   :  { %396 = vmatmul.bf16.gmra.mxu1 %v312_v2 }
 0x110   :  { %v261_v3 = vpop.f32.mrf.mxu0 }
 0x111   :  { %v262_v4 = vadd.f32 %v832_v25, %v261_v3  ;;  %v819_v3 = vld [vmem:[#allocation8 + $0x20] sm:$0xff] }
 0x112   :  { %580 = vmatpush.bf16.msra.mxu3 %v819_v3 }
 0x113   :  { %v283_v7 = vmax.f32 %v262_v4, 0.0 }
 0x118   :  { %v263_v5 = vpop.f32.mrf.mxu0 }
 0x119   :  { %v264_v6 = vadd.f32 %v832_v25, %v263_v5 }
 0x11b   :  { %v284_v8 = vmax.f32 %v264_v6, 0.0 }
 0x11d   :  { %v313_v9 = vpack.c.bf16 %v284_v8, %v283_v7  ;;  %v818_v8 = vld [vmem:[#allocation8 + $0x18] sm:$0xff] }
 0x11e   :  { %581 = vmatpush.bf16.msra.mxu3 %v818_v8 }
 0x11f   :  { %401 = vmatmul.bf16.gmra.mxu1 %v313_v9  ;;  %v817_v9 = vld [vmem:[#allocation8 + $0x10] sm:$0xff] }
 0x120   :  { %v266_v10 = vpop.f32.mrf.mxu0 }
 0x121   :  { %v267_v11 = vadd.f32 %v832_v25, %v266_v10 }
 0x122   :  { %582 = vmatpush.bf16.msra.mxu3 %v817_v9 }
 0x123   :  { %v285_v14 = vmax.f32 %v267_v11, 0.0 }
 0x128   :  { %v268_v12 = vpop.f32.mrf.mxu0 }
 0x129   :  { %v269_v13 = vadd.f32 %v832_v25, %v268_v12  ;;  %v816_v12 = vld [vmem:[#allocation8 + $0x8] sm:$0xff] }
 0x12a   :  { %583 = vmatpush.bf16.msra.mxu3 %v816_v12 }
 0x12b   :  { %v286_v15 = vmax.f32 %v269_v13, 0.0 }
 0x12d   :  { %v314_v16 = vpack.c.bf16 %v286_v15, %v285_v14 }
 0x12f   :  { %406 = vmatmul.bf16.gmra.mxu1 %v314_v16  ;;  %v815_v16 = vld [vmem:[#allocation8] sm:$0xff] }
 0x130   :  { %584 = vmatpush.bf16.msra.mxu3 %v815_v16 }
 0x13c   :  { %v372_v17 = vpop.f32.mrf.mxu1 }
 0x13d   :  { %v373_v19 = vadd.f32 %v1030_v18, %v372_v17 }
 0x13f   :  { %v412_v22 = vmax.f32 %v373_v19, 0.0 }
 0x144   :  { %v374_v20 = vpop.f32.mrf.mxu1 }
 0x145   :  { %v375_v21 = vadd.f32 %v1030_v18, %v374_v20 }
 0x147   :  { %v413_v23 = vmax.f32 %v375_v21, 0.0 }
 0x149   :  { %v428_v24 = vpack.c.bf16 %v413_v23, %v412_v22 }
 0x14b   :  { %444 = vmatmul.bf16.vlgmr.msra.gmra.mxu2 %v428_v24 }
 0x14c   :  { %v377_v25 = vpop.f32.mrf.mxu1 }
 0x14d   :  { %v378_v26 = vadd.f32 %v1030_v18, %v377_v25 }
 0x14f   :  { %v414_v29 = vmax.f32 %v378_v26, 0.0 }
 0x154   :  { %v379_v27 = vpop.f32.mrf.mxu1 }
 0x155   :  { %v380_v28 = vadd.f32 %v1030_v18, %v379_v27 }
 0x157   :  { %v415_v30 = vmax.f32 %v380_v28, 0.0 }
 0x159   :  { %v429_v31 = vpack.c.bf16 %v415_v30, %v414_v29 }
 0x15b   :  { %449 = vmatmul.bf16.gmra.mxu2 %v429_v31 }
 0x15c   :  { %v382_v32 = vpop.f32.mrf.mxu1 }
 0x15d   :  { %v383_v33 = vadd.f32 %v1030_v18, %v382_v32 }
 0x15f   :  { %v416_v36 = vmax.f32 %v383_v33, 0.0 }
 0x164   :  { %v384_v34 = vpop.f32.mrf.mxu1 }
 0x165   :  { %v385_v35 = vadd.f32 %v1030_v18, %v384_v34 }
 0x167   :  { %v417_v37 = vmax.f32 %v385_v35, 0.0 }
 0x169   :  { %v430_v38 = vpack.c.bf16 %v417_v37, %v416_v36 }
 0x16b   :  { %454 = vmatmul.bf16.gmra.mxu2 %v430_v38 }
 0x16c   :  { %v387_v39 = vpop.f32.mrf.mxu1 }
 0x16d   :  { %v388_v40 = vadd.f32 %v1030_v18, %v387_v39 }
 0x16f   :  { %v418_v43 = vmax.f32 %v388_v40, 0.0 }
 0x174   :  { %v389_v41 = vpop.f32.mrf.mxu1 }
 0x175   :  { %v390_v42 = vadd.f32 %v1030_v18, %v389_v41 }
 0x177   :  { %v419_v44 = vmax.f32 %v390_v42, 0.0 }
 0x179   :  { %v431_v45 = vpack.c.bf16 %v419_v44, %v418_v43 }
 0x17b   :  { %459 = vmatmul.bf16.gmra.mxu2 %v431_v45 }
 0x17c   :  { %v392_v46 = vpop.f32.mrf.mxu1 }
 0x17d   :  { %v393_v47 = vadd.f32 %v1030_v18, %v392_v46 }
 0x17f   :  { %v420_v50 = vmax.f32 %v393_v47, 0.0 }
 0x184   :  { %v394_v48 = vpop.f32.mrf.mxu1 }
 0x185   :  { %v395_v49 = vadd.f32 %v1030_v18, %v394_v48 }
 0x187   :  { %v421_v51 = vmax.f32 %v395_v49, 0.0 }
 0x189   :  { %v432_v52 = vpack.c.bf16 %v421_v51, %v420_v50 }
 0x18b   :  { %464 = vmatmul.bf16.gmra.mxu2 %v432_v52 }
 0x18c   :  { %v397_v53 = vpop.f32.mrf.mxu1 }
 0x18d   :  { %v398_v54 = vadd.f32 %v1030_v18, %v397_v53 }
 0x18f   :  { %v422_v57 = vmax.f32 %v398_v54, 0.0 }
 0x194   :  { %v399_v55 = vpop.f32.mrf.mxu1 }
 0x195   :  { %v400_v56 = vadd.f32 %v1030_v18, %v399_v55 }
 0x197   :  { %v423_v58 = vmax.f32 %v400_v56, 0.0 }
 0x199   :  { %v433_v59 = vpack.c.bf16 %v423_v58, %v422_v57 }
 0x19b   :  { %469 = vmatmul.bf16.gmra.mxu2 %v433_v59 }
 0x19c   :  { %v402_v61 = vpop.f32.mrf.mxu1 }
 0x19d   :  { %v403_v0 = vadd.f32 %v1030_v18, %v402_v61 }
 0x19f   :  { %v424_v4 = vmax.f32 %v403_v0, 0.0 }
 0x1a4   :  { %v404_v1 = vpop.f32.mrf.mxu1 }
 0x1a5   :  { %v405_v2 = vadd.f32 %v1030_v18, %v404_v1 }
 0x1a7   :  { %v425_v5 = vmax.f32 %v405_v2, 0.0 }
 0x1a9   :  { %v434_v6 = vpack.c.bf16 %v425_v5, %v424_v4 }
 0x1ab   :  { %474 = vmatmul.bf16.gmra.mxu2 %v434_v6 }
 0x1ac   :  { %v407_v7 = vpop.f32.mrf.mxu1 }
 0x1ad   :  { %v408_v10 = vadd.f32 %v1030_v18, %v407_v7 }
 0x1af   :  { %v426_v14 = vmax.f32 %v408_v10, 0.0 }
 0x1b4   :  { %v409_v11 = vpop.f32.mrf.mxu1 }
 0x1b5   :  { %v410_v13 = vadd.f32 %v1030_v18, %v409_v11  ;;  %v834_v11 = vld [vmem:[%s1076_s6] ss:$0 sm:$0xff]  ;;  %s969_s6 = smov [#allocation10]  }
 0x1b6   :  { %s646_s23 = sshll.u32 %s969_s6, 4  ;;  %s647_s23 = int_to_ptr.vmem [resolvable:$true] %s646_s23 }
 0x1b7   :  { %v427_v15 = vmax.f32 %v410_v13, 0.0 }
 0x1b9   :  { %v435_v17 = vpack.c.bf16 %v427_v15, %v426_v14 }
 0x1bb   :  { %479 = vmatmul.bf16.gmra.mxu2 %v435_v17 }
 0x1ce   :  { %v445_v19 = vpop.f32.mrf.mxu2 }
 0x1cf   :  { %v446_v20 = vadd.f32 %v1030_v18, %v445_v19 }
 0x1d1   :  { %v485_v23 = vmax.f32 %v446_v20, 0.0 }
 0x1d6   :  { %v447_v21 = vpop.f32.mrf.mxu2 }
 0x1d7   :  { %v448_v22 = vadd.f32 %v1030_v18, %v447_v21 }
 0x1d9   :  { %v486_v24 = vmax.f32 %v448_v22, 0.0 }
 0x1db   :  { %v501_v25 = vpack.c.bf16 %v486_v24, %v485_v23 }
 0x1dd   :  { %585 = vmatmul.bf16.vlgmr.msra.gmra.mxu3 %v501_v25 }
 0x1de   :  { %v450_v26 = vpop.f32.mrf.mxu2 }
 0x1df   :  { %v451_v27 = vadd.f32 %v1030_v18, %v450_v26 }
 0x1e1   :  { %v487_v30 = vmax.f32 %v451_v27, 0.0 }
 0x1e6   :  { %v452_v28 = vpop.f32.mrf.mxu2 }
 0x1e7   :  { %v453_v29 = vadd.f32 %v1030_v18, %v452_v28 }
 0x1e9   :  { %v488_v31 = vmax.f32 %v453_v29, 0.0 }
 0x1eb   :  { %v502_v32 = vpack.c.bf16 %v488_v31, %v487_v30 }
 0x1ed   :  { %590 = vmatmul.bf16.gmra.mxu3 %v502_v32 }
 0x1ee   :  { %v455_v33 = vpop.f32.mrf.mxu2 }
 0x1ef   :  { %v456_v34 = vadd.f32 %v1030_v18, %v455_v33 }
 0x1f1   :  { %v489_v37 = vmax.f32 %v456_v34, 0.0 }
 0x1f6   :  { %v457_v35 = vpop.f32.mrf.mxu2 }
 0x1f7   :  { %v458_v36 = vadd.f32 %v1030_v18, %v457_v35 }
 0x1f9   :  { %v490_v38 = vmax.f32 %v458_v36, 0.0 }
 0x1fb   :  { %v503_v39 = vpack.c.bf16 %v490_v38, %v489_v37 }
 0x1fd   :  { %595 = vmatmul.bf16.gmra.mxu3 %v503_v39 }
 0x1fe   :  { %v460_v40 = vpop.f32.mrf.mxu2 }
 0x1ff   :  { %v461_v41 = vadd.f32 %v1030_v18, %v460_v40 }
 0x201   :  { %v491_v44 = vmax.f32 %v461_v41, 0.0 }
 0x206   :  { %v462_v42 = vpop.f32.mrf.mxu2 }
 0x207   :  { %v463_v43 = vadd.f32 %v1030_v18, %v462_v42 }
 0x209   :  { %v492_v45 = vmax.f32 %v463_v43, 0.0 }
 0x20b   :  { %v504_v46 = vpack.c.bf16 %v492_v45, %v491_v44 }
 0x20d   :  { %600 = vmatmul.bf16.gmra.mxu3 %v504_v46 }
 0x20e   :  { %v465_v47 = vpop.f32.mrf.mxu2 }
 0x20f   :  { %v466_v48 = vadd.f32 %v1030_v18, %v465_v47 }
 0x211   :  { %v493_v51 = vmax.f32 %v466_v48, 0.0 }
 0x216   :  { %v467_v49 = vpop.f32.mrf.mxu2 }
 0x217   :  { %v468_v50 = vadd.f32 %v1030_v18, %v467_v49 }
 0x219   :  { %v494_v52 = vmax.f32 %v468_v50, 0.0 }
 0x21b   :  { %v505_v53 = vpack.c.bf16 %v494_v52, %v493_v51 }
 0x21d   :  { %605 = vmatmul.bf16.gmra.mxu3 %v505_v53 }
 0x21e   :  { %v470_v54 = vpop.f32.mrf.mxu2 }
 0x21f   :  { %v471_v55 = vadd.f32 %v1030_v18, %v470_v54 }
 0x221   :  { %v495_v58 = vmax.f32 %v471_v55, 0.0 }
 0x226   :  { %v472_v56 = vpop.f32.mrf.mxu2 }
 0x227   :  { %v473_v57 = vadd.f32 %v1030_v18, %v472_v56 }
 0x229   :  { %v496_v59 = vmax.f32 %v473_v57, 0.0 }
 0x22b   :  { %v506_v60 = vpack.c.bf16 %v496_v59, %v495_v58 }
 0x22d   :  { %610 = vmatmul.bf16.gmra.mxu3 %v506_v60 }
 0x22e   :  { %v475_v61 = vpop.f32.mrf.mxu2 }
 0x22f   :  { %v476_v62 = vadd.f32 %v1030_v18, %v475_v61 }
 0x231   :  { %v497_v1 = vmax.f32 %v476_v62, 0.0 }
 0x236   :  { %v477_v63 = vpop.f32.mrf.mxu2 }
 0x237   :  { %v478_v0 = vadd.f32 %v1030_v18, %v477_v63 }
 0x239   :  { %v498_v2 = vmax.f32 %v478_v0, 0.0 }
 0x23b   :  { %v507_v3 = vpack.c.bf16 %v498_v2, %v497_v1 }
 0x23d   :  { %615 = vmatmul.bf16.gmra.mxu3 %v507_v3 }
 0x23e   :  { %v480_v4 = vpop.f32.mrf.mxu2 }
 0x23f   :  { %v481_v5 = vadd.f32 %v1030_v18, %v480_v4 }
 0x241   :  { %v499_v8 = vmax.f32 %v481_v5, 0.0 }
 0x246   :  { %v482_v6 = vpop.f32.mrf.mxu2 }
 0x247   :  { %v483_v7 = vadd.f32 %v1030_v18, %v482_v6 }
 0x249   :  { %v500_v9 = vmax.f32 %v483_v7, 0.0 }
 0x24b   :  { %v508_v10 = vpack.c.bf16 %v500_v9, %v499_v8 }
 0x24d   :  { %620 = vmatmul.bf16.gmra.mxu3 %v508_v10 }
 0x260   :  { %v586_v12 = vpop.f32.mrf.mxu3 }
 0x261   :  { %v587_v13 = vadd.f32 %v834_v11, %v586_v12 }
 0x263   :  { %626 = vst [vmem:[#allocation10] sm:$0xff] %v587_v13 }
 0x268   :  { %v588_v14 = vpop.f32.mrf.mxu3 }
 0x269   :  { %v589_v15 = vadd.f32 %v834_v11, %v588_v14 }
 0x26b   :  { %627 = vst [vmem:[#allocation10 + $0x8] sm:$0xff] %v589_v15 }
 0x270   :  { %v591_v16 = vpop.f32.mrf.mxu3 }
 0x271   :  { %v592_v17 = vadd.f32 %v834_v11, %v591_v16 }
 0x273   :  { %628 = vst [vmem:[#allocation10 + $0x10] sm:$0xff] %v592_v17 }
 0x278   :  { %v593_v19 = vpop.f32.mrf.mxu3 }
 0x279   :  { %v594_v20 = vadd.f32 %v834_v11, %v593_v19 }
 0x27b   :  { %629 = vst [vmem:[#allocation10 + $0x18] sm:$0xff] %v594_v20 }
 0x280   :  { %v596_v18 = vpop.f32.mrf.mxu3 }
 0x281   :  { %v597_v21 = vadd.f32 %v834_v11, %v596_v18 }
 0x283   :  { %630 = vst [vmem:[#allocation10 + $0x20] sm:$0xff] %v597_v21 }
 0x288   :  { %v598_v22 = vpop.f32.mrf.mxu3 }
 0x289   :  { %v599_v23 = vadd.f32 %v834_v11, %v598_v22 }
 0x28b   :  { %631 = vst [vmem:[#allocation10 + $0x28] sm:$0xff] %v599_v23 }
 0x290   :  { %v601_v24 = vpop.f32.mrf.mxu3 }
 0x291   :  { %v602_v25 = vadd.f32 %v834_v11, %v601_v24 }
 0x293   :  { %632 = vst [vmem:[#allocation10 + $0x30] sm:$0xff] %v602_v25 }
 0x298   :  { %v603_v26 = vpop.f32.mrf.mxu3 }
 0x299   :  { %v604_v27 = vadd.f32 %v834_v11, %v603_v26 }
 0x29b   :  { %633 = vst [vmem:[#allocation10 + $0x38] sm:$0xff] %v604_v27 }
 0x2a0   :  { %v606_v28 = vpop.f32.mrf.mxu3 }
 0x2a1   :  { %v607_v29 = vadd.f32 %v834_v11, %v606_v28 }
 0x2a3   :  { %634 = vst [vmem:[#allocation10 + $0x40] sm:$0xff] %v607_v29 }
 0x2a8   :  { %v608_v30 = vpop.f32.mrf.mxu3 }
 0x2a9   :  { %v609_v31 = vadd.f32 %v834_v11, %v608_v30 }
 0x2ab   :  { %635 = vst [vmem:[#allocation10 + $0x48] sm:$0xff] %v609_v31 }
 0x2b0   :  { %v611_v32 = vpop.f32.mrf.mxu3 }
 0x2b1   :  { %v612_v33 = vadd.f32 %v834_v11, %v611_v32 }
 0x2b3   :  { %636 = vst [vmem:[#allocation10 + $0x50] sm:$0xff] %v612_v33 }
 0x2b8   :  { %v613_v34 = vpop.f32.mrf.mxu3 }
 0x2b9   :  { %v614_v35 = vadd.f32 %v834_v11, %v613_v34 }
 0x2bb   :  { %637 = vst [vmem:[#allocation10 + $0x58] sm:$0xff] %v614_v35 }
 0x2c0   :  { %v616_v36 = vpop.f32.mrf.mxu3 }
 0x2c1   :  { %v617_v37 = vadd.f32 %v834_v11, %v616_v36 }
 0x2c3   :  { %638 = vst [vmem:[#allocation10 + $0x60] sm:$0xff] %v617_v37 }
 0x2c8   :  { %v618_v38 = vpop.f32.mrf.mxu3 }
 0x2c9   :  { %v619_v39 = vadd.f32 %v834_v11, %v618_v38 }
 0x2cb   :  { %639 = vst [vmem:[#allocation10 + $0x68] sm:$0xff] %v619_v39 }
 0x2d0   :  { %v621_v40 = vpop.f32.mrf.mxu3 }
 0x2d1   :  { %v622_v41 = vadd.f32 %v834_v11, %v621_v40 }
 0x2d3   :  { %640 = vst [vmem:[#allocation10 + $0x70] sm:$0xff] %v622_v41 }
 0x2d8   :  { %v623_v42 = vpop.f32.mrf.mxu3 }
 0x2d9   :  { %v624_v43 = vadd.f32 %v834_v11, %v623_v42 }
 0x2db   :  { %641 = vst [vmem:[#allocation10 + $0x78] sm:$0xff] %v624_v43 }
 0x2dc   :  { %654 = dma.vmem_to_hbm [thread:$0]  %s647_s23, 2048, %s649_s26, [#allocation4], %s970_s27, %s970_s27, %s971_s28  }
 0x2dd   :  { %961 = dma.done.wait [#allocation4], 2048  }
 0x2de   :  { %962 = vsyncadd [#allocation4], 4294965248 }
 0x2df   :  { %659 = vsyncpa [#allocation3], 1 }
 0x2e0   :  { %660 = vsyncpa [#allocation6], 1 }
 0x2e1   :  { %661 = vsyncpa [#allocation9], 1 }
 0x2e2   :  { %662 = vsyncpa [#allocation4], 1 }

</bundles_post_ra>
